<compile_context>
chip_gen: v5e
topology: v5e:2x2
jax: 0.10.0
libtpu: 0.0.40
codegen_flags: <defaults>
</compile_context>

<pallas_src>
import functools

import numpy as np
import jax
import jax.numpy as jnp
from jax.experimental import pallas as pl
from jax.experimental.pallas import tpu as pltpu

_MIN_LOW_HZ = 50.0
_MIN_BAND_HZ = 50.0


# ---------------------------------------------------------------------------
# SincConvFast filter-bank synthesis (exact SincNet formulas).
# Tiny (C, K) computation on the learnable (low_hz_, band_hz_); left to XLA.
# ---------------------------------------------------------------------------

def sinc_filters(low_hz_, band_hz_, kernel_size, sample_rate):
    k = kernel_size
    m = int(k / 2)
    n_lin = np.linspace(0.0, (k / 2.0) - 1.0, num=m)
    window = (0.54 - 0.46 * np.cos(2.0 * np.pi * n_lin / k)).astype(np.float32)
    n = (2.0 * np.pi * np.arange(-(k - 1) / 2.0, 0.0) / sample_rate).astype(np.float32)
    n_ = jnp.asarray(n)[None, :]              # (1, m)  negative half
    window_ = jnp.asarray(window)[None, :]    # (1, m)  half Hamming window

    low = _MIN_LOW_HZ + jnp.abs(low_hz_)                                   # (Wf, 1)
    high = jnp.clip(low + _MIN_BAND_HZ + jnp.abs(band_hz_),
                    _MIN_LOW_HZ, sample_rate / 2.0)                        # (Wf, 1)
    band = high - low                                                      # (Wf, 1)

    f_low = low * n_                                                       # (Wf, m)
    f_high = high * n_
    bp_left = ((jnp.sin(f_high) - jnp.sin(f_low)) / (n_ / 2.0)) * window_  # (Wf, m)
    bp_center = 2.0 * band                                                 # (Wf, 1)
    bp_right = jnp.flip(bp_left, axis=1)                                   # (Wf, m)
    bp = jnp.concatenate([bp_left, bp_center, bp_right], axis=1)           # (Wf, K)
    return bp / (2.0 * band)


# ---------------------------------------------------------------------------
# Fused Pallas kernel: 1-D conv (as one MXU matmul) + activation.
# ---------------------------------------------------------------------------

def _make_sinc_block_kernel(activation: str):

    def kernel(xp_ref, filt_ref, alpha_ref, o_ref, patches_ref):
        # xp_ref:      (1, 1, L_pad)  reflect-padded input for this batch elem
        # filt_ref:    (Wf, Kp)       sinc filter bank (zero-padded along K)
        # alpha_ref:   (C, 1)         PReLU slopes (ignored for 'glu')
        # o_ref:       (1, C, T)      output block (lane dim = time, dense)
        # patches_ref: (Kp, T)        VMEM scratch: im2col / Hankel matrix
        wf, kp = filt_ref.shape
        t = o_ref.shape[2]

        # im2col (stride = 1): patches[k, t] = x_pad[k + t]
        for k in range(kp):
            patches_ref[pl.ds(k, 1), :] = xp_ref[0, :, pl.ds(k, t)]

        # Single MXU matmul instead of a K-tap accumulate loop.
        acc = jnp.dot(filt_ref[...], patches_ref[...],
                      preferred_element_type=jnp.float32)            # (Wf, T)

        if activation == "glu":
            c = wf // 2
            z, g = acc[:c, :], acc[c:, :]
            y = z * pl.reciprocal(1.0 + jnp.exp(-g), approx=True)    # z * sigmoid(g)
        else:  # activation=None in the PyTorch module -> per-channel PReLU
            a = alpha_ref[...]                                       # (C, 1)
            y = jnp.where(acc >= 0.0, acc, a * acc)

        o_ref[0] = y.astype(o_ref.dtype)

    return kernel


@functools.partial(
    jax.jit,
    static_argnames=("kernel_size", "sample_rate", "stride", "activation"))
def sinc_block_forward(x, low_hz_, band_hz_, prelu_alpha, *,
                       kernel_size, sample_rate, stride=1, activation="prelu"):
    """x: (N, 1, L) float32  ->  (N, out_channels, L) float32."""
    n_batch, in_ch, length = x.shape
    assert in_ch == 1, in_ch                    # SincBlock asserts in_channels == 1
    assert kernel_size % 2 == 1, kernel_size    # SincConvFast forces odd kernels
    # TODO(synk): stride > 1 / dilation > 1 / padding modes other than 'SAME'
    # are not implemented (demo uses stride=1, 'SAME', reflect - the defaults).
    assert stride == 1, stride

    c_out = prelu_alpha.shape[0]
    assert c_out % 8 == 0, c_out                # keep channel dim sublane-aligned

    filt = sinc_filters(low_hz_, band_hz_, kernel_size, sample_rate)   # (Wf, K)
    wf = filt.shape[0]
    assert wf == (2 * c_out if activation == "glu" else c_out)

    # Pad the contraction dim (K) up to a multiple of 8 sublanes with zero taps.
    kp = ((kernel_size + 7) // 8) * 8
    filt_p = jnp.pad(filt, ((0, 0), (0, kp - kernel_size)))

    # 'SAME' padding, reflect mode (what SincConvFast does for stride == 1),
    # plus (kp - K) zeros on the right so the im2col has kp rows (their filter
    # weights are zero, so the values are irrelevant).
    half = kernel_size // 2
    xp = jnp.pad(x, ((0, 0), (0, 0), (half, half)), mode="reflect")
    xp = jnp.pad(xp, ((0, 0), (0, 0), (0, kp - kernel_size)))
    l_pad = length + kp - 1
    t_out = length

    alpha = prelu_alpha.reshape(c_out, 1).astype(jnp.float32)

    return pl.pallas_call(
        _make_sinc_block_kernel(activation),
        out_shape=jax.ShapeDtypeStruct((n_batch, c_out, t_out), x.dtype),
        grid=(n_batch,),
        in_specs=[
            pl.BlockSpec((1, 1, l_pad), lambda n: (n, 0, 0)),
            pl.BlockSpec((wf, kp), lambda n: (0, 0)),
            pl.BlockSpec((c_out, 1), lambda n: (0, 0)),
        ],
        out_specs=pl.BlockSpec((1, c_out, t_out), lambda n: (n, 0, 0)),
        scratch_shapes=[pltpu.VMEM((kp, t_out), jnp.float32)],
        compiler_params=pltpu.CompilerParams(
            dimension_semantics=("parallel",)),
    )(xp, filt_p, alpha)


# ---------------------------------------------------------------------------
# Parameters (SincConvFast mel-spaced init + PReLU slopes) and pure-JAX ref.
# ---------------------------------------------------------------------------

def init_sinc_block_params(key, out_channels, kernel_size, sample_rate, activation):
    wf = 2 * out_channels if activation == "glu" else out_channels
    to_mel = lambda hz: 2595.0 * np.log10(1.0 + hz / 700.0)
    to_hz = lambda mel: 700.0 * (10.0 ** (mel / 2595.0) - 1.0)
    low, high = 30.0, sample_rate / 2.0 - (_MIN_LOW_HZ + _MIN_BAND_HZ)
    hz = to_hz(np.linspace(to_mel(low), to_mel(high), wf + 1))
    k1, k2 = jax.random.split(key)
    low_hz_ = jnp.asarray(hz[:-1, None], jnp.float32)
    band_hz_ = jnp.asarray(np.diff(hz)[:, None], jnp.float32)
    low_hz_ = low_hz_ * (1.0 + 0.01 * jax.random.normal(k1, low_hz_.shape, jnp.float32))
    band_hz_ = band_hz_ * (1.0 + 0.01 * jax.random.normal(k2, band_hz_.shape, jnp.float32))
    prelu_alpha = 0.25 * jnp.ones((out_channels,), jnp.float32)  # nn.PReLU default
    return {"low_hz_": low_hz_, "band_hz_": band_hz_, "prelu_alpha": prelu_alpha}


def sinc_block_reference(x, params, *, kernel_size, sample_rate, activation):
    """Pure-JAX reference (lax.conv) used only for a correctness check."""
    filt = sinc_filters(params["low_hz_"], params["band_hz_"], kernel_size, sample_rate)
    half = kernel_size // 2
    xp = jnp.pad(x, ((0, 0), (0, 0), (half, half)), mode="reflect")
    h = jax.lax.conv_general_dilated(
        xp, filt[:, None, :], window_strides=(1,), padding="VALID",
        dimension_numbers=("NCH", "OIH", "NCH"),
        precision=jax.lax.Precision.HIGHEST)
    if activation == "glu":
        c = filt.shape[0] // 2
        return h[:, :c, :] * jax.nn.sigmoid(h[:, c:, :])
    a = params["prelu_alpha"][None, :, None]
    return jnp.where(h >= 0.0, h, a * h)


# ---------------------------------------------------------------------------
# Main
# ---------------------------------------------------------------------------

if __name__ == "__main__":
    key = jax.random.PRNGKey(0)
    k_param, k_x = jax.random.split(key)

    batch, in_channels, seq_len = 2, 1, 512
    out_channels, kernel_size, sample_rate = 32, 33, 16000

    x = jax.random.normal(k_x, (batch, in_channels, seq_len), jnp.float32)

    for activation in ("prelu", "glu"):   # default (activation=None) -> PReLU
        params = init_sinc_block_params(k_param, out_channels, kernel_size,
                                        sample_rate, activation)
        out = sinc_block_forward(
            x, params["low_hz_"], params["band_hz_"], params["prelu_alpha"],
            kernel_size=kernel_size, sample_rate=sample_rate,
            stride=1, activation=activation)
        out = jax.block_until_ready(out)

        ref = jax.block_until_ready(
            sinc_block_reference(x, params, kernel_size=kernel_size,
                                 sample_rate=sample_rate, activation=activation))

        assert out.shape == (batch, out_channels, seq_len), out.shape
        assert bool(jnp.all(jnp.isfinite(out)))
        scale = float(jnp.max(jnp.abs(ref)))
        err = float(jnp.max(jnp.abs(out - ref)))
        assert err <= 3e-2 * scale + 1e-3, (activation, err, scale)

    print("KERNEL_OK")
</pallas_src>

<mosaic_0001>
module attributes {stable_mosaic.version = 11 : i64} {
  func.func @kernel(%arg0: i32, %arg1: memref<1x1x551xf32, #tpu.memory_space<vmem>>, %arg2: memref<32x40xf32, #tpu.memory_space<vmem>>, %arg3: memref<32x1xf32, #tpu.memory_space<vmem>>, %arg4: memref<1x32x512xf32, #tpu.memory_space<vmem>>, %arg5: memref<40x512xf32, #tpu.memory_space<vmem>>) attributes {dimension_semantics = [#tpu.dimension_semantics<parallel>], iteration_bounds = array<i64: 2>, scalar_prefetch = 0 : i64, scratch_operands = 1 : i64, tpu.core_type = #tpu.core_type<tc>, window_params = [{transform_indices = @transform_0, window_bounds = array<i64: 1, 1, 551>}, {pipeline_mode = #tpu.pipeline_mode<synchronous>, transform_indices = @transform_1, window_bounds = array<i64: 32, 40>}, {pipeline_mode = #tpu.pipeline_mode<synchronous>, transform_indices = @transform_2, window_bounds = array<i64: 32, 1>}, {transform_indices = @transform_3, window_bounds = array<i64: 1, 32, 512>}]} {
    %c0 = arith.constant 0 : index
    %c0_0 = arith.constant 0 : index
    %c0_1 = arith.constant 0 : index
    %0 = vector.load %arg1[%c0, %c0_0, %c0_1] : memref<1x1x551xf32, #tpu.memory_space<vmem>>, vector<1x1x512xf32>
    %1 = vector.shape_cast %0 : vector<1x1x512xf32> to vector<1x512xf32>
    %c0_2 = arith.constant 0 : index
    %c0_3 = arith.constant 0 : index
    %2 = vector.load %arg5[%c0_2, %c0_3] : memref<40x512xf32, #tpu.memory_space<vmem>>, vector<1x512xf32>
    tpu.vector_store %arg5[%c0_2, %c0_3], %1 {strides = array<i32>} : memref<40x512xf32, #tpu.memory_space<vmem>>, vector<1x512xf32>,
    %c0_4 = arith.constant 0 : index
    %c0_5 = arith.constant 0 : index
    %c1 = arith.constant 1 : index
    %3 = vector.load %arg1[%c0_4, %c0_5, %c1] : memref<1x1x551xf32, #tpu.memory_space<vmem>>, vector<1x1x512xf32>
    %4 = vector.shape_cast %3 : vector<1x1x512xf32> to vector<1x512xf32>
    %c1_6 = arith.constant 1 : index
    %c0_7 = arith.constant 0 : index
    %5 = vector.load %arg5[%c1_6, %c0_7] : memref<40x512xf32, #tpu.memory_space<vmem>>, vector<1x512xf32>
    tpu.vector_store %arg5[%c1_6, %c0_7], %4 {strides = array<i32>} : memref<40x512xf32, #tpu.memory_space<vmem>>, vector<1x512xf32>,
    %c0_8 = arith.constant 0 : index
    %c0_9 = arith.constant 0 : index
    %c2 = arith.constant 2 : index
    %6 = vector.load %arg1[%c0_8, %c0_9, %c2] : memref<1x1x551xf32, #tpu.memory_space<vmem>>, vector<1x1x512xf32>
    %7 = vector.shape_cast %6 : vector<1x1x512xf32> to vector<1x512xf32>
    %c2_10 = arith.constant 2 : index
    %c0_11 = arith.constant 0 : index
    %8 = vector.load %arg5[%c2_10, %c0_11] : memref<40x512xf32, #tpu.memory_space<vmem>>, vector<1x512xf32>
    tpu.vector_store %arg5[%c2_10, %c0_11], %7 {strides = array<i32>} : memref<40x512xf32, #tpu.memory_space<vmem>>, vector<1x512xf32>,
    %c0_12 = arith.constant 0 : index
    %c0_13 = arith.constant 0 : index
    %c3 = arith.constant 3 : index
    %9 = vector.load %arg1[%c0_12, %c0_13, %c3] : memref<1x1x551xf32, #tpu.memory_space<vmem>>, vector<1x1x512xf32>
    %10 = vector.shape_cast %9 : vector<1x1x512xf32> to vector<1x512xf32>
    %c3_14 = arith.constant 3 : index
    %c0_15 = arith.constant 0 : index
    %11 = vector.load %arg5[%c3_14, %c0_15] : memref<40x512xf32, #tpu.memory_space<vmem>>, vector<1x512xf32>
    tpu.vector_store %arg5[%c3_14, %c0_15], %10 {strides = array<i32>} : memref<40x512xf32, #tpu.memory_space<vmem>>, vector<1x512xf32>,
    %c0_16 = arith.constant 0 : index
    %c0_17 = arith.constant 0 : index
    %c4 = arith.constant 4 : index
    %12 = vector.load %arg1[%c0_16, %c0_17, %c4] : memref<1x1x551xf32, #tpu.memory_space<vmem>>, vector<1x1x512xf32>
    %13 = vector.shape_cast %12 : vector<1x1x512xf32> to vector<1x512xf32>
    %c4_18 = arith.constant 4 : index
    %c0_19 = arith.constant 0 : index
    %14 = vector.load %arg5[%c4_18, %c0_19] : memref<40x512xf32, #tpu.memory_space<vmem>>, vector<1x512xf32>
    tpu.vector_store %arg5[%c4_18, %c0_19], %13 {strides = array<i32>} : memref<40x512xf32, #tpu.memory_space<vmem>>, vector<1x512xf32>,
    %c0_20 = arith.constant 0 : index
    %c0_21 = arith.constant 0 : index
    %c5 = arith.constant 5 : index
    %15 = vector.load %arg1[%c0_20, %c0_21, %c5] : memref<1x1x551xf32, #tpu.memory_space<vmem>>, vector<1x1x512xf32>
    %16 = vector.shape_cast %15 : vector<1x1x512xf32> to vector<1x512xf32>
    %c5_22 = arith.constant 5 : index
    %c0_23 = arith.constant 0 : index
    %17 = vector.load %arg5[%c5_22, %c0_23] : memref<40x512xf32, #tpu.memory_space<vmem>>, vector<1x512xf32>
    tpu.vector_store %arg5[%c5_22, %c0_23], %16 {strides = array<i32>} : memref<40x512xf32, #tpu.memory_space<vmem>>, vector<1x512xf32>,
    %c0_24 = arith.constant 0 : index
    %c0_25 = arith.constant 0 : index
    %c6 = arith.constant 6 : index
    %18 = vector.load %arg1[%c0_24, %c0_25, %c6] : memref<1x1x551xf32, #tpu.memory_space<vmem>>, vector<1x1x512xf32>
    %19 = vector.shape_cast %18 : vector<1x1x512xf32> to vector<1x512xf32>
    %c6_26 = arith.constant 6 : index
    %c0_27 = arith.constant 0 : index
    %20 = vector.load %arg5[%c6_26, %c0_27] : memref<40x512xf32, #tpu.memory_space<vmem>>, vector<1x512xf32>
    tpu.vector_store %arg5[%c6_26, %c0_27], %19 {strides = array<i32>} : memref<40x512xf32, #tpu.memory_space<vmem>>, vector<1x512xf32>,
    %c0_28 = arith.constant 0 : index
    %c0_29 = arith.constant 0 : index
    %c7 = arith.constant 7 : index
    %21 = vector.load %arg1[%c0_28, %c0_29, %c7] : memref<1x1x551xf32, #tpu.memory_space<vmem>>, vector<1x1x512xf32>
    %22 = vector.shape_cast %21 : vector<1x1x512xf32> to vector<1x512xf32>
    %c7_30 = arith.constant 7 : index
    %c0_31 = arith.constant 0 : index
    %23 = vector.load %arg5[%c7_30, %c0_31] : memref<40x512xf32, #tpu.memory_space<vmem>>, vector<1x512xf32>
    tpu.vector_store %arg5[%c7_30, %c0_31], %22 {strides = array<i32>} : memref<40x512xf32, #tpu.memory_space<vmem>>, vector<1x512xf32>,
    %c0_32 = arith.constant 0 : index
    %c0_33 = arith.constant 0 : index
    %c8 = arith.constant 8 : index
    %24 = vector.load %arg1[%c0_32, %c0_33, %c8] : memref<1x1x551xf32, #tpu.memory_space<vmem>>, vector<1x1x512xf32>
    %25 = vector.shape_cast %24 : vector<1x1x512xf32> to vector<1x512xf32>
    %c8_34 = arith.constant 8 : index
    %c0_35 = arith.constant 0 : index
    %26 = vector.load %arg5[%c8_34, %c0_35] : memref<40x512xf32, #tpu.memory_space<vmem>>, vector<1x512xf32>
    tpu.vector_store %arg5[%c8_34, %c0_35], %25 {strides = array<i32>} : memref<40x512xf32, #tpu.memory_space<vmem>>, vector<1x512xf32>,
    %c0_36 = arith.constant 0 : index
    %c0_37 = arith.constant 0 : index
    %c9 = arith.constant 9 : index
    %27 = vector.load %arg1[%c0_36, %c0_37, %c9] : memref<1x1x551xf32, #tpu.memory_space<vmem>>, vector<1x1x512xf32>
    %28 = vector.shape_cast %27 : vector<1x1x512xf32> to vector<1x512xf32>
    %c9_38 = arith.constant 9 : index
    %c0_39 = arith.constant 0 : index
    %29 = vector.load %arg5[%c9_38, %c0_39] : memref<40x512xf32, #tpu.memory_space<vmem>>, vector<1x512xf32>
    tpu.vector_store %arg5[%c9_38, %c0_39], %28 {strides = array<i32>} : memref<40x512xf32, #tpu.memory_space<vmem>>, vector<1x512xf32>,
    %c0_40 = arith.constant 0 : index
    %c0_41 = arith.constant 0 : index
    %c10 = arith.constant 10 : index
    %30 = vector.load %arg1[%c0_40, %c0_41, %c10] : memref<1x1x551xf32, #tpu.memory_space<vmem>>, vector<1x1x512xf32>
    %31 = vector.shape_cast %30 : vector<1x1x512xf32> to vector<1x512xf32>
    %c10_42 = arith.constant 10 : index
    %c0_43 = arith.constant 0 : index
    %32 = vector.load %arg5[%c10_42, %c0_43] : memref<40x512xf32, #tpu.memory_space<vmem>>, vector<1x512xf32>
    tpu.vector_store %arg5[%c10_42, %c0_43], %31 {strides = array<i32>} : memref<40x512xf32, #tpu.memory_space<vmem>>, vector<1x512xf32>,
    %c0_44 = arith.constant 0 : index
    %c0_45 = arith.constant 0 : index
    %c11 = arith.constant 11 : index
    %33 = vector.load %arg1[%c0_44, %c0_45, %c11] : memref<1x1x551xf32, #tpu.memory_space<vmem>>, vector<1x1x512xf32>
    %34 = vector.shape_cast %33 : vector<1x1x512xf32> to vector<1x512xf32>
    %c11_46 = arith.constant 11 : index
    %c0_47 = arith.constant 0 : index
    %35 = vector.load %arg5[%c11_46, %c0_47] : memref<40x512xf32, #tpu.memory_space<vmem>>, vector<1x512xf32>
    tpu.vector_store %arg5[%c11_46, %c0_47], %34 {strides = array<i32>} : memref<40x512xf32, #tpu.memory_space<vmem>>, vector<1x512xf32>,
    %c0_48 = arith.constant 0 : index
    %c0_49 = arith.constant 0 : index
    %c12 = arith.constant 12 : index
    %36 = vector.load %arg1[%c0_48, %c0_49, %c12] : memref<1x1x551xf32, #tpu.memory_space<vmem>>, vector<1x1x512xf32>
    %37 = vector.shape_cast %36 : vector<1x1x512xf32> to vector<1x512xf32>
    %c12_50 = arith.constant 12 : index
    %c0_51 = arith.constant 0 : index
    %38 = vector.load %arg5[%c12_50, %c0_51] : memref<40x512xf32, #tpu.memory_space<vmem>>, vector<1x512xf32>
    tpu.vector_store %arg5[%c12_50, %c0_51], %37 {strides = array<i32>} : memref<40x512xf32, #tpu.memory_space<vmem>>, vector<1x512xf32>,
    %c0_52 = arith.constant 0 : index
    %c0_53 = arith.constant 0 : index
    %c13 = arith.constant 13 : index
    %39 = vector.load %arg1[%c0_52, %c0_53, %c13] : memref<1x1x551xf32, #tpu.memory_space<vmem>>, vector<1x1x512xf32>
    %40 = vector.shape_cast %39 : vector<1x1x512xf32> to vector<1x512xf32>
    %c13_54 = arith.constant 13 : index
    %c0_55 = arith.constant 0 : index
    %41 = vector.load %arg5[%c13_54, %c0_55] : memref<40x512xf32, #tpu.memory_space<vmem>>, vector<1x512xf32>
    tpu.vector_store %arg5[%c13_54, %c0_55], %40 {strides = array<i32>} : memref<40x512xf32, #tpu.memory_space<vmem>>, vector<1x512xf32>,
    %c0_56 = arith.constant 0 : index
    %c0_57 = arith.constant 0 : index
    %c14 = arith.constant 14 : index
    %42 = vector.load %arg1[%c0_56, %c0_57, %c14] : memref<1x1x551xf32, #tpu.memory_space<vmem>>, vector<1x1x512xf32>
    %43 = vector.shape_cast %42 : vector<1x1x512xf32> to vector<1x512xf32>
    %c14_58 = arith.constant 14 : index
    %c0_59 = arith.constant 0 : index
    %44 = vector.load %arg5[%c14_58, %c0_59] : memref<40x512xf32, #tpu.memory_space<vmem>>, vector<1x512xf32>
    tpu.vector_store %arg5[%c14_58, %c0_59], %43 {strides = array<i32>} : memref<40x512xf32, #tpu.memory_space<vmem>>, vector<1x512xf32>,
    %c0_60 = arith.constant 0 : index
    %c0_61 = arith.constant 0 : index
    %c15 = arith.constant 15 : index
    %45 = vector.load %arg1[%c0_60, %c0_61, %c15] : memref<1x1x551xf32, #tpu.memory_space<vmem>>, vector<1x1x512xf32>
    %46 = vector.shape_cast %45 : vector<1x1x512xf32> to vector<1x512xf32>
    %c15_62 = arith.constant 15 : index
    %c0_63 = arith.constant 0 : index
    %47 = vector.load %arg5[%c15_62, %c0_63] : memref<40x512xf32, #tpu.memory_space<vmem>>, vector<1x512xf32>
    tpu.vector_store %arg5[%c15_62, %c0_63], %46 {strides = array<i32>} : memref<40x512xf32, #tpu.memory_space<vmem>>, vector<1x512xf32>,
    %c0_64 = arith.constant 0 : index
    %c0_65 = arith.constant 0 : index
    %c16 = arith.constant 16 : index
    %48 = vector.load %arg1[%c0_64, %c0_65, %c16] : memref<1x1x551xf32, #tpu.memory_space<vmem>>, vector<1x1x512xf32>
    %49 = vector.shape_cast %48 : vector<1x1x512xf32> to vector<1x512xf32>
    %c16_66 = arith.constant 16 : index
    %c0_67 = arith.constant 0 : index
    %50 = vector.load %arg5[%c16_66, %c0_67] : memref<40x512xf32, #tpu.memory_space<vmem>>, vector<1x512xf32>
    tpu.vector_store %arg5[%c16_66, %c0_67], %49 {strides = array<i32>} : memref<40x512xf32, #tpu.memory_space<vmem>>, vector<1x512xf32>,
    %c0_68 = arith.constant 0 : index
    %c0_69 = arith.constant 0 : index
    %c17 = arith.constant 17 : index
    %51 = vector.load %arg1[%c0_68, %c0_69, %c17] : memref<1x1x551xf32, #tpu.memory_space<vmem>>, vector<1x1x512xf32>
    %52 = vector.shape_cast %51 : vector<1x1x512xf32> to vector<1x512xf32>
    %c17_70 = arith.constant 17 : index
    %c0_71 = arith.constant 0 : index
    %53 = vector.load %arg5[%c17_70, %c0_71] : memref<40x512xf32, #tpu.memory_space<vmem>>, vector<1x512xf32>
    tpu.vector_store %arg5[%c17_70, %c0_71], %52 {strides = array<i32>} : memref<40x512xf32, #tpu.memory_space<vmem>>, vector<1x512xf32>,
    %c0_72 = arith.constant 0 : index
    %c0_73 = arith.constant 0 : index
    %c18 = arith.constant 18 : index
    %54 = vector.load %arg1[%c0_72, %c0_73, %c18] : memref<1x1x551xf32, #tpu.memory_space<vmem>>, vector<1x1x512xf32>
    %55 = vector.shape_cast %54 : vector<1x1x512xf32> to vector<1x512xf32>
    %c18_74 = arith.constant 18 : index
    %c0_75 = arith.constant 0 : index
    %56 = vector.load %arg5[%c18_74, %c0_75] : memref<40x512xf32, #tpu.memory_space<vmem>>, vector<1x512xf32>
    tpu.vector_store %arg5[%c18_74, %c0_75], %55 {strides = array<i32>} : memref<40x512xf32, #tpu.memory_space<vmem>>, vector<1x512xf32>,
    %c0_76 = arith.constant 0 : index
    %c0_77 = arith.constant 0 : index
    %c19 = arith.constant 19 : index
    %57 = vector.load %arg1[%c0_76, %c0_77, %c19] : memref<1x1x551xf32, #tpu.memory_space<vmem>>, vector<1x1x512xf32>
    %58 = vector.shape_cast %57 : vector<1x1x512xf32> to vector<1x512xf32>
    %c19_78 = arith.constant 19 : index
    %c0_79 = arith.constant 0 : index
    %59 = vector.load %arg5[%c19_78, %c0_79] : memref<40x512xf32, #tpu.memory_space<vmem>>, vector<1x512xf32>
    tpu.vector_store %arg5[%c19_78, %c0_79], %58 {strides = array<i32>} : memref<40x512xf32, #tpu.memory_space<vmem>>, vector<1x512xf32>,
    %c0_80 = arith.constant 0 : index
    %c0_81 = arith.constant 0 : index
    %c20 = arith.constant 20 : index
    %60 = vector.load %arg1[%c0_80, %c0_81, %c20] : memref<1x1x551xf32, #tpu.memory_space<vmem>>, vector<1x1x512xf32>
    %61 = vector.shape_cast %60 : vector<1x1x512xf32> to vector<1x512xf32>
    %c20_82 = arith.constant 20 : index
    %c0_83 = arith.constant 0 : index
    %62 = vector.load %arg5[%c20_82, %c0_83] : memref<40x512xf32, #tpu.memory_space<vmem>>, vector<1x512xf32>
    tpu.vector_store %arg5[%c20_82, %c0_83], %61 {strides = array<i32>} : memref<40x512xf32, #tpu.memory_space<vmem>>, vector<1x512xf32>,
    %c0_84 = arith.constant 0 : index
    %c0_85 = arith.constant 0 : index
    %c21 = arith.constant 21 : index
    %63 = vector.load %arg1[%c0_84, %c0_85, %c21] : memref<1x1x551xf32, #tpu.memory_space<vmem>>, vector<1x1x512xf32>
    %64 = vector.shape_cast %63 : vector<1x1x512xf32> to vector<1x512xf32>
    %c21_86 = arith.constant 21 : index
    %c0_87 = arith.constant 0 : index
    %65 = vector.load %arg5[%c21_86, %c0_87] : memref<40x512xf32, #tpu.memory_space<vmem>>, vector<1x512xf32>
    tpu.vector_store %arg5[%c21_86, %c0_87], %64 {strides = array<i32>} : memref<40x512xf32, #tpu.memory_space<vmem>>, vector<1x512xf32>,
    %c0_88 = arith.constant 0 : index
    %c0_89 = arith.constant 0 : index
    %c22 = arith.constant 22 : index
    %66 = vector.load %arg1[%c0_88, %c0_89, %c22] : memref<1x1x551xf32, #tpu.memory_space<vmem>>, vector<1x1x512xf32>
    %67 = vector.shape_cast %66 : vector<1x1x512xf32> to vector<1x512xf32>
    %c22_90 = arith.constant 22 : index
    %c0_91 = arith.constant 0 : index
    %68 = vector.load %arg5[%c22_90, %c0_91] : memref<40x512xf32, #tpu.memory_space<vmem>>, vector<1x512xf32>
    tpu.vector_store %arg5[%c22_90, %c0_91], %67 {strides = array<i32>} : memref<40x512xf32, #tpu.memory_space<vmem>>, vector<1x512xf32>,
    %c0_92 = arith.constant 0 : index
    %c0_93 = arith.constant 0 : index
    %c23 = arith.constant 23 : index
    %69 = vector.load %arg1[%c0_92, %c0_93, %c23] : memref<1x1x551xf32, #tpu.memory_space<vmem>>, vector<1x1x512xf32>
    %70 = vector.shape_cast %69 : vector<1x1x512xf32> to vector<1x512xf32>
    %c23_94 = arith.constant 23 : index
    %c0_95 = arith.constant 0 : index
    %71 = vector.load %arg5[%c23_94, %c0_95] : memref<40x512xf32, #tpu.memory_space<vmem>>, vector<1x512xf32>
    tpu.vector_store %arg5[%c23_94, %c0_95], %70 {strides = array<i32>} : memref<40x512xf32, #tpu.memory_space<vmem>>, vector<1x512xf32>,
    %c0_96 = arith.constant 0 : index
    %c0_97 = arith.constant 0 : index
    %c24 = arith.constant 24 : index
    %72 = vector.load %arg1[%c0_96, %c0_97, %c24] : memref<1x1x551xf32, #tpu.memory_space<vmem>>, vector<1x1x512xf32>
    %73 = vector.shape_cast %72 : vector<1x1x512xf32> to vector<1x512xf32>
    %c24_98 = arith.constant 24 : index
    %c0_99 = arith.constant 0 : index
    %74 = vector.load %arg5[%c24_98, %c0_99] : memref<40x512xf32, #tpu.memory_space<vmem>>, vector<1x512xf32>
    tpu.vector_store %arg5[%c24_98, %c0_99], %73 {strides = array<i32>} : memref<40x512xf32, #tpu.memory_space<vmem>>, vector<1x512xf32>,
    %c0_100 = arith.constant 0 : index
    %c0_101 = arith.constant 0 : index
    %c25 = arith.constant 25 : index
    %75 = vector.load %arg1[%c0_100, %c0_101, %c25] : memref<1x1x551xf32, #tpu.memory_space<vmem>>, vector<1x1x512xf32>
    %76 = vector.shape_cast %75 : vector<1x1x512xf32> to vector<1x512xf32>
    %c25_102 = arith.constant 25 : index
    %c0_103 = arith.constant 0 : index
    %77 = vector.load %arg5[%c25_102, %c0_103] : memref<40x512xf32, #tpu.memory_space<vmem>>, vector<1x512xf32>
    tpu.vector_store %arg5[%c25_102, %c0_103], %76 {strides = array<i32>} : memref<40x512xf32, #tpu.memory_space<vmem>>, vector<1x512xf32>,
    %c0_104 = arith.constant 0 : index
    %c0_105 = arith.constant 0 : index
    %c26 = arith.constant 26 : index
    %78 = vector.load %arg1[%c0_104, %c0_105, %c26] : memref<1x1x551xf32, #tpu.memory_space<vmem>>, vector<1x1x512xf32>
    %79 = vector.shape_cast %78 : vector<1x1x512xf32> to vector<1x512xf32>
    %c26_106 = arith.constant 26 : index
    %c0_107 = arith.constant 0 : index
    %80 = vector.load %arg5[%c26_106, %c0_107] : memref<40x512xf32, #tpu.memory_space<vmem>>, vector<1x512xf32>
    tpu.vector_store %arg5[%c26_106, %c0_107], %79 {strides = array<i32>} : memref<40x512xf32, #tpu.memory_space<vmem>>, vector<1x512xf32>,
    %c0_108 = arith.constant 0 : index
    %c0_109 = arith.constant 0 : index
    %c27 = arith.constant 27 : index
    %81 = vector.load %arg1[%c0_108, %c0_109, %c27] : memref<1x1x551xf32, #tpu.memory_space<vmem>>, vector<1x1x512xf32>
    %82 = vector.shape_cast %81 : vector<1x1x512xf32> to vector<1x512xf32>
    %c27_110 = arith.constant 27 : index
    %c0_111 = arith.constant 0 : index
    %83 = vector.load %arg5[%c27_110, %c0_111] : memref<40x512xf32, #tpu.memory_space<vmem>>, vector<1x512xf32>
    tpu.vector_store %arg5[%c27_110, %c0_111], %82 {strides = array<i32>} : memref<40x512xf32, #tpu.memory_space<vmem>>, vector<1x512xf32>,
    %c0_112 = arith.constant 0 : index
    %c0_113 = arith.constant 0 : index
    %c28 = arith.constant 28 : index
    %84 = vector.load %arg1[%c0_112, %c0_113, %c28] : memref<1x1x551xf32, #tpu.memory_space<vmem>>, vector<1x1x512xf32>
    %85 = vector.shape_cast %84 : vector<1x1x512xf32> to vector<1x512xf32>
    %c28_114 = arith.constant 28 : index
    %c0_115 = arith.constant 0 : index
    %86 = vector.load %arg5[%c28_114, %c0_115] : memref<40x512xf32, #tpu.memory_space<vmem>>, vector<1x512xf32>
    tpu.vector_store %arg5[%c28_114, %c0_115], %85 {strides = array<i32>} : memref<40x512xf32, #tpu.memory_space<vmem>>, vector<1x512xf32>,
    %c0_116 = arith.constant 0 : index
    %c0_117 = arith.constant 0 : index
    %c29 = arith.constant 29 : index
    %87 = vector.load %arg1[%c0_116, %c0_117, %c29] : memref<1x1x551xf32, #tpu.memory_space<vmem>>, vector<1x1x512xf32>
    %88 = vector.shape_cast %87 : vector<1x1x512xf32> to vector<1x512xf32>
    %c29_118 = arith.constant 29 : index
    %c0_119 = arith.constant 0 : index
    %89 = vector.load %arg5[%c29_118, %c0_119] : memref<40x512xf32, #tpu.memory_space<vmem>>, vector<1x512xf32>
    tpu.vector_store %arg5[%c29_118, %c0_119], %88 {strides = array<i32>} : memref<40x512xf32, #tpu.memory_space<vmem>>, vector<1x512xf32>,
    %c0_120 = arith.constant 0 : index
    %c0_121 = arith.constant 0 : index
    %c30 = arith.constant 30 : index
    %90 = vector.load %arg1[%c0_120, %c0_121, %c30] : memref<1x1x551xf32, #tpu.memory_space<vmem>>, vector<1x1x512xf32>
    %91 = vector.shape_cast %90 : vector<1x1x512xf32> to vector<1x512xf32>
    %c30_122 = arith.constant 30 : index
    %c0_123 = arith.constant 0 : index
    %92 = vector.load %arg5[%c30_122, %c0_123] : memref<40x512xf32, #tpu.memory_space<vmem>>, vector<1x512xf32>
    tpu.vector_store %arg5[%c30_122, %c0_123], %91 {strides = array<i32>} : memref<40x512xf32, #tpu.memory_space<vmem>>, vector<1x512xf32>,
    %c0_124 = arith.constant 0 : index
    %c0_125 = arith.constant 0 : index
    %c31 = arith.constant 31 : index
    %93 = vector.load %arg1[%c0_124, %c0_125, %c31] : memref<1x1x551xf32, #tpu.memory_space<vmem>>, vector<1x1x512xf32>
    %94 = vector.shape_cast %93 : vector<1x1x512xf32> to vector<1x512xf32>
    %c31_126 = arith.constant 31 : index
    %c0_127 = arith.constant 0 : index
    %95 = vector.load %arg5[%c31_126, %c0_127] : memref<40x512xf32, #tpu.memory_space<vmem>>, vector<1x512xf32>
    tpu.vector_store %arg5[%c31_126, %c0_127], %94 {strides = array<i32>} : memref<40x512xf32, #tpu.memory_space<vmem>>, vector<1x512xf32>,
    %c0_128 = arith.constant 0 : index
    %c0_129 = arith.constant 0 : index
    %c32 = arith.constant 32 : index
    %96 = vector.load %arg1[%c0_128, %c0_129, %c32] : memref<1x1x551xf32, #tpu.memory_space<vmem>>, vector<1x1x512xf32>
    %97 = vector.shape_cast %96 : vector<1x1x512xf32> to vector<1x512xf32>
    %c32_130 = arith.constant 32 : index
    %c0_131 = arith.constant 0 : index
    %98 = vector.load %arg5[%c32_130, %c0_131] : memref<40x512xf32, #tpu.memory_space<vmem>>, vector<1x512xf32>
    tpu.vector_store %arg5[%c32_130, %c0_131], %97 {strides = array<i32>} : memref<40x512xf32, #tpu.memory_space<vmem>>, vector<1x512xf32>,
    %c0_132 = arith.constant 0 : index
    %c0_133 = arith.constant 0 : index
    %c33 = arith.constant 33 : index
    %99 = vector.load %arg1[%c0_132, %c0_133, %c33] : memref<1x1x551xf32, #tpu.memory_space<vmem>>, vector<1x1x512xf32>
    %100 = vector.shape_cast %99 : vector<1x1x512xf32> to vector<1x512xf32>
    %c33_134 = arith.constant 33 : index
    %c0_135 = arith.constant 0 : index
    %101 = vector.load %arg5[%c33_134, %c0_135] : memref<40x512xf32, #tpu.memory_space<vmem>>, vector<1x512xf32>
    tpu.vector_store %arg5[%c33_134, %c0_135], %100 {strides = array<i32>} : memref<40x512xf32, #tpu.memory_space<vmem>>, vector<1x512xf32>,
    %c0_136 = arith.constant 0 : index
    %c0_137 = arith.constant 0 : index
    %c34 = arith.constant 34 : index
    %102 = vector.load %arg1[%c0_136, %c0_137, %c34] : memref<1x1x551xf32, #tpu.memory_space<vmem>>, vector<1x1x512xf32>
    %103 = vector.shape_cast %102 : vector<1x1x512xf32> to vector<1x512xf32>
    %c34_138 = arith.constant 34 : index
    %c0_139 = arith.constant 0 : index
    %104 = vector.load %arg5[%c34_138, %c0_139] : memref<40x512xf32, #tpu.memory_space<vmem>>, vector<1x512xf32>
    tpu.vector_store %arg5[%c34_138, %c0_139], %103 {strides = array<i32>} : memref<40x512xf32, #tpu.memory_space<vmem>>, vector<1x512xf32>,
    %c0_140 = arith.constant 0 : index
    %c0_141 = arith.constant 0 : index
    %c35 = arith.constant 35 : index
    %105 = vector.load %arg1[%c0_140, %c0_141, %c35] : memref<1x1x551xf32, #tpu.memory_space<vmem>>, vector<1x1x512xf32>
    %106 = vector.shape_cast %105 : vector<1x1x512xf32> to vector<1x512xf32>
    %c35_142 = arith.constant 35 : index
    %c0_143 = arith.constant 0 : index
    %107 = vector.load %arg5[%c35_142, %c0_143] : memref<40x512xf32, #tpu.memory_space<vmem>>, vector<1x512xf32>
    tpu.vector_store %arg5[%c35_142, %c0_143], %106 {strides = array<i32>} : memref<40x512xf32, #tpu.memory_space<vmem>>, vector<1x512xf32>,
    %c0_144 = arith.constant 0 : index
    %c0_145 = arith.constant 0 : index
    %c36 = arith.constant 36 : index
    %108 = vector.load %arg1[%c0_144, %c0_145, %c36] : memref<1x1x551xf32, #tpu.memory_space<vmem>>, vector<1x1x512xf32>
    %109 = vector.shape_cast %108 : vector<1x1x512xf32> to vector<1x512xf32>
    %c36_146 = arith.constant 36 : index
    %c0_147 = arith.constant 0 : index
    %110 = vector.load %arg5[%c36_146, %c0_147] : memref<40x512xf32, #tpu.memory_space<vmem>>, vector<1x512xf32>
    tpu.vector_store %arg5[%c36_146, %c0_147], %109 {strides = array<i32>} : memref<40x512xf32, #tpu.memory_space<vmem>>, vector<1x512xf32>,
    %c0_148 = arith.constant 0 : index
    %c0_149 = arith.constant 0 : index
    %c37 = arith.constant 37 : index
    %111 = vector.load %arg1[%c0_148, %c0_149, %c37] : memref<1x1x551xf32, #tpu.memory_space<vmem>>, vector<1x1x512xf32>
    %112 = vector.shape_cast %111 : vector<1x1x512xf32> to vector<1x512xf32>
    %c37_150 = arith.constant 37 : index
    %c0_151 = arith.constant 0 : index
    %113 = vector.load %arg5[%c37_150, %c0_151] : memref<40x512xf32, #tpu.memory_space<vmem>>, vector<1x512xf32>
    tpu.vector_store %arg5[%c37_150, %c0_151], %112 {strides = array<i32>} : memref<40x512xf32, #tpu.memory_space<vmem>>, vector<1x512xf32>,
    %c0_152 = arith.constant 0 : index
    %c0_153 = arith.constant 0 : index
    %c38 = arith.constant 38 : index
    %114 = vector.load %arg1[%c0_152, %c0_153, %c38] : memref<1x1x551xf32, #tpu.memory_space<vmem>>, vector<1x1x512xf32>
    %115 = vector.shape_cast %114 : vector<1x1x512xf32> to vector<1x512xf32>
    %c38_154 = arith.constant 38 : index
    %c0_155 = arith.constant 0 : index
    %116 = vector.load %arg5[%c38_154, %c0_155] : memref<40x512xf32, #tpu.memory_space<vmem>>, vector<1x512xf32>
    tpu.vector_store %arg5[%c38_154, %c0_155], %115 {strides = array<i32>} : memref<40x512xf32, #tpu.memory_space<vmem>>, vector<1x512xf32>,
    %c0_156 = arith.constant 0 : index
    %c0_157 = arith.constant 0 : index
    %c39 = arith.constant 39 : index
    %117 = vector.load %arg1[%c0_156, %c0_157, %c39] : memref<1x1x551xf32, #tpu.memory_space<vmem>>, vector<1x1x512xf32>
    %118 = vector.shape_cast %117 : vector<1x1x512xf32> to vector<1x512xf32>
    %c39_158 = arith.constant 39 : index
    %c0_159 = arith.constant 0 : index
    %119 = vector.load %arg5[%c39_158, %c0_159] : memref<40x512xf32, #tpu.memory_space<vmem>>, vector<1x512xf32>
    tpu.vector_store %arg5[%c39_158, %c0_159], %118 {strides = array<i32>} : memref<40x512xf32, #tpu.memory_space<vmem>>, vector<1x512xf32>,
    %c0_160 = arith.constant 0 : index
    %c0_161 = arith.constant 0 : index
    %120 = vector.load %arg2[%c0_160, %c0_161] : memref<32x40xf32, #tpu.memory_space<vmem>>, vector<32x40xf32>
    %c0_162 = arith.constant 0 : index
    %c0_163 = arith.constant 0 : index
    %121 = vector.load %arg5[%c0_162, %c0_163] : memref<40x512xf32, #tpu.memory_space<vmem>>, vector<40x512xf32>
    %cst = arith.constant dense<0.000000e+00> : vector<32x512xf32>
    %122 = tpu.matmul %120, %121, %cst {dimension_numbers = #tpu.dot_dimension_numbers<[1], [0], [0], [1], [0, 0, 1, 1], [], []>} : vector<32x40xf32>, vector<40x512xf32>, vector<32x512xf32> -> vector<32x512xf32>
    %c0_164 = arith.constant 0 : index
    %c0_165 = arith.constant 0 : index
    %123 = vector.load %arg3[%c0_164, %c0_165] : memref<32x1xf32, #tpu.memory_space<vmem>>, vector<32x1xf32>
    %cst_166 = arith.constant 0.000000e+00 : f32
    %124 = vector.broadcast %cst_166 : f32 to vector<32x512xf32>
    %125 = arith.cmpf oge, %122, %124 : vector<32x512xf32>
    %126 = vector.broadcast %123 : vector<32x1xf32> to vector<32x512xf32>
    %127 = arith.mulf %126, %122 : vector<32x512xf32>
    %128 = arith.select %125, %122, %127 : vector<32x512xi1>, vector<32x512xf32>
    %c0_167 = arith.constant 0 : index
    %c0_168 = arith.constant 0 : index
    %c0_169 = arith.constant 0 : index
    %129 = vector.load %arg4[%c0_167, %c0_168, %c0_169] : memref<1x32x512xf32, #tpu.memory_space<vmem>>, vector<1x32x512xf32>
    %130 = vector.shape_cast %129 : vector<1x32x512xf32> to vector<32x512xf32>
    %131 = vector.shape_cast %128 : vector<32x512xf32> to vector<1x32x512xf32>
    tpu.vector_store %arg4[%c0_167, %c0_168, %c0_169], %131 {strides = array<i32>} : memref<1x32x512xf32, #tpu.memory_space<vmem>>, vector<1x32x512xf32>,
    return
  }
  func.func @transform_0(%arg0: i32) -> (i32, i32, i32) {
    %c0_i32 = arith.constant 0 : i32
    %c0_i32_0 = arith.constant 0 : i32
    %c0_i32_1 = arith.constant 0 : i32
    return %arg0, %c0_i32, %c0_i32_0 : i32, i32, i32
  }
  func.func @transform_1(%arg0: i32) -> (i32, i32) {
    %c0_i32 = arith.constant 0 : i32
    %c0_i32_0 = arith.constant 0 : i32
    %c0_i32_1 = arith.constant 0 : i32
    return %c0_i32, %c0_i32_0 : i32, i32
  }
  func.func @transform_2(%arg0: i32) -> (i32, i32) {
    %c0_i32 = arith.constant 0 : i32
    %c0_i32_0 = arith.constant 0 : i32
    %c0_i32_1 = arith.constant 0 : i32
    return %c0_i32, %c0_i32_0 : i32, i32
  }
  func.func @transform_3(%arg0: i32) -> (i32, i32, i32) {
    %c0_i32 = arith.constant 0 : i32
    %c0_i32_0 = arith.constant 0 : i32
    %c0_i32_1 = arith.constant 0 : i32
    return %arg0, %c0_i32, %c0_i32_0 : i32, i32, i32
  }
}

</mosaic_0001>

<bundles_post_ra>
// kernel: sinc_block_forward.1
= control target key start
LH: loop header
LB: loop body
LE: loop exit
PB: predicated region body
PF: predicated region fallthrough
CT: control target
= control target key end

     0   :  { %8 = vsyncpa [#allocation4], 0  ;;  %s1433_s0 = inlined_call_operand.vmem [shape: f32[2,1,551], index: 0, kind: input, shape index: {}]   ;;  %s1434_s1 = inlined_call_operand.vmem [shape: f32[32,40], index: 1, kind: input, shape index: {}]   ;;  %s1435_s2 = inlined_call_operand.vmem [shape: f32[32,1], index: 2, kind: input, shape index: {}]   ;;  %s1436_s3 = inlined_call_operand.hbm [shape: f32[2,32,512], index: 3, kind: output, shape index: {}]  }
   0x1   :  { %10 = vsyncpa [#allocation4 + $0x1], 0  ;;  %s1159_s12 = smov 0   ;;  %s1161_s13 = smov 0  }
   0x2   :  { %s1163_s14 = smov 0   ;;  %s1165_s15 = smov 0  }
   0x3 LB: > { %s1180_s16 = sadd.s32 4294967295, %s1095_s15   ;;  %s921_s17 = sadd.s32 4294967294, %s1095_s15   ;;  %s1095_s15 = sphi %s1165_s15, %s1444_s15   ;;  %s1091_s14 = sphi %s1163_s14, %s1443_s14   ;;  %s1087_s13 = sphi %s1161_s13, %s1442_s13   ;;  %s1083_s12 = sphi %s1159_s12, %s1441_s12  }
   0x4   : > { %s1184_s18 = sadd.s32 1, %s1095_s15   ;;  %s91_s19 = sadd.s32 1, %s1091_s14 }
   0x5   : > { %s88_s20 = ssub.s32 %s1095_s15, %s1184_s18  ;;  %p101_p0 = scmp.ne.s32.totalorder %s1091_s14, %s1087_s13 }
   0x6   : > { %p89_p1 = scmp.eq.s32.totalorder %s88_s20, 0  ;;  %p102_p2 = scmp.eq.s32.totalorder %s1180_s16, 1 }
   0x7   : > { %p107_p3 = scmp.ne.s32.totalorder %s1087_s13, %s1083_s12  ;;  %p108_p4 = scmp.eq.s32.totalorder %s921_s17, 1 }
   0x8   : > { %s1195_s21 = scalar_select %p89_p1, %s1091_s14, %s91_s19  }
   0x9   : > { %p1197_p5 = por %p102_p2, %p101_p0  ;;  %p1201_p6 = por %p108_p4, %p107_p3 }
   0xa   : > { %p924_p7 = scmp.ge.s32.totalorder %s1095_s15, 1  ;;  %p139_p8 = scmp.lt.s32.totalorder %s1095_s15, 3 }
   0xc   : > { %p140_p9 = pnand %p924_p7, %p139_p8 }
   0xd   : > { %p162_p10 = scmp.lt.s32.totalorder (!%p140_p9), %s1180_s16, 1  ;;  %s1097_s29 = smov (!%p140_p9), 94  }
   0xe   : > { %143 = sbr.rel (%p140_p9) target bundleno = 415 (0x19f), region = 32  ;;  %s1098_s30 = smov (!%p140_p9), 96  }
   0xf   : > { %s1099_s4 = smov (!%p140_p9), 92   ;;  %s1100_s5 = smov (!%p140_p9), 93  }
  0x10   : > { %s1101_s6 = smov (!%p140_p9), 95   ;;  %s1102_s7 = smov (!%p140_p9), 91  }
  0x11   : > { %s1103_s8 = smov (!%p140_p9), 89   ;;  %s1104_s9 = smov (!%p140_p9), 90  }
  0x12   : > { %s1105_s10 = smov (!%p140_p9), 104   ;;  %s1106_s11 = smov (!%p140_p9), 102  }
  0x13   : > { %s163_s24 = scalar_select %p162_p10, %s1180_s16, 1  ;;  %v167_v36 = vlaneseq  ;;  %vm563_vm0 = vcmask 752640   ;;  %vm574_vm2 = vcmask 744448   ;;  %vm431_vm3 = vcmask 850944  }
  0x14   : > { %s1107_s17 = smov 103   ;;  %s1108_s19 = smov 101   ;;  %vm541_vm4 = vcmask 769024   ;;  %vm519_vm5 = vcmask 785408   ;;  %vm464_vm6 = vcmask 826368   ;;  %vm552_vm7 = vcmask 760832  }
  0x15   : > { %s948_s25 = smul.u32 5, %s163_s24  ;;  %s1109_s20 = smov 99   ;;  %vm1252_vm1 = vcmp.lt.s32.totalorder %v167_v36, 512  ;;  %vm530_vm8 = vcmask 777216   ;;  %vm497_vm9 = vcmask 801792   ;;  %vm596_vm10 = vcmask 728064  }
  0x16   : > { %s1110_s24 = smov 100   ;;  %s1112_s26 = smov 97   ;;  %vm585_vm11 = vcmask 736256   ;;  %vm354_vm12 = vcmask 908288   ;;  %vm453_vm13 = vcmask 834560   ;;  %vm442_vm14 = vcmask 842752  }
  0x17   : > { %s1212_s28 = scalar_lea.vmem %s1433_s0, %s948_s25  ;;  %s1111_s25 = smov 98   ;;  %vm387_vm15 = vcmask 883712  }
  0x18   : > { %v536_v0 = vld [vmem:[%s1212_s28] sm:$0x1f]  ;;  %s1113_s27 = smov 112  }
  0x19   : > { %v514_v1 = vld [vmem:[%s1212_s28] sm:$0x1f]  ;;  %538 = vrot.lane.b32.xlu1 %v536_v0, %s1097_s29  ;;  %s1114_s29 = smov 111  }
  0x1a   : > { %516 = vrot.lane.b32.xlu0 %v514_v1, %s1098_s30  ;;  %v558_v2 = vld [vmem:[%s1212_s28] sm:$0x1f]  ;;  %s1115_s30 = smov 110  }
  0x1b   : > { %560 = vrot.lane.b32.xlu2 %v558_v2, %s1099_s4  ;;  %v547_v3 = vld [vmem:[%s1212_s28] sm:$0x1f]  ;;  %s1116_s4 = smov 109  }
  0x1c   : > { %v525_v4 = vld [vmem:[%s1212_s28] sm:$0x1f] }
  0x1d   : > { %v569_v5 = vld [vmem:[%s1212_s28] sm:$0x1f] }
  0x1e   : > { %v591_v6 = vld [vmem:[%s1212_s28] sm:$0x1f] }
  0x1f   : > { %v580_v7 = vld [vmem:[%s1212_s28] sm:$0x1f] }
  0x20   : > { %v426_v8 = vld [vmem:[%s1212_s28] sm:$0x1f] }
  0x21   : > { %549 = vrot.lane.b32.xlu1 %v547_v3, %s1100_s5  ;;  %v448_v9 = vld [vmem:[%s1212_s28] sm:$0x1f]  ;;  %s1117_s5 = smov 108  }
  0x22   : > { %527 = vrot.lane.b32.xlu0 %v525_v4, %s1101_s6  ;;  %v437_v10 = vld [vmem:[%s1212_s28] sm:$0x1f]  ;;  %s1118_s6 = smov 107  }
  0x23   : > { %571 = vrot.lane.b32.xlu2 %v569_v5, %s1102_s7  ;;  %v459_v11 = vld [vmem:[%s1212_s28] sm:$0x1f]  ;;  %s1119_s7 = smov 106  }
  0x24   : > { %v481_v12 = vld [vmem:[%s1212_s28] sm:$0x1f] }
  0x25   : > { %v470_v13 = vld [vmem:[%s1212_s28] sm:$0x1f] }
  0x26   : > { %v492_v14 = vld [vmem:[%s1212_s28] sm:$0x1f] }
  0x27   : > { %v503_v15 = vld [vmem:[%s1212_s28] sm:$0x1f] }
  0x28   : > { %v338_v16 = vld [vmem:[%s1212_s28] sm:$0x1f] }
  0x29   : > { %593 = vrot.lane.b32.xlu1 %v591_v6, %s1103_s8  ;;  %v349_v17 = vld [vmem:[%s1212_s28] sm:$0x1f]  ;;  %s1120_s8 = smov 105  }
  0x2a   : > { %582 = vrot.lane.b32.xlu0 %v580_v7, %s1104_s9  ;;  %v360_v18 = vld [vmem:[%s1212_s28] sm:$0x1f]  ;;  %s1121_s9 = smov 119  }
  0x2b   : > { %428 = vrot.lane.b32.xlu2 %v426_v8, %s1105_s10  ;;  %v371_v19 = vld [vmem:[%s1212_s28] sm:$0x1f]  ;;  %s1122_s10 = smov 120  }
  0x2c   : > { %v382_v20 = vld [vmem:[%s1212_s28] sm:$0x1f] }
  0x2d   : > { %v393_v21 = vld [vmem:[%s1212_s28] sm:$0x1f] }
  0x2e   : > { %v404_v22 = vld [vmem:[%s1212_s28] sm:$0x1f] }
  0x2f   : > { %v415_v23 = vld [vmem:[%s1212_s28] sm:$0x1f] }
  0x30   : > { %v261_v24 = vld [vmem:[%s1212_s28] sm:$0x1f] }
  0x31   : > { %450 = vrot.lane.b32.xlu1 %v448_v9, %s1106_s11  ;;  %v250_v25 = vld [vmem:[%s1212_s28] sm:$0x1f]  ;;  %s1123_s11 = smov 118  }
  0x32   : > { %439 = vrot.lane.b32.xlu0 %v437_v10, %s1107_s17  ;;  %v272_v26 = vld [vmem:[%s1212_s28] sm:$0x1f]  ;;  %s1124_s17 = smov 116  }
  0x33   : > { %461 = vrot.lane.b32.xlu2 %v459_v11, %s1108_s19  ;;  %v294_v27 = vld [vmem:[%s1212_s28] sm:$0x1f]  ;;  %s1125_s19 = smov 117  }
  0x34   : > { %v283_v28 = vld [vmem:[%s1212_s28] sm:$0x1f] }
  0x35   : > { %v305_v29 = vld [vmem:[%s1212_s28] sm:$0x1f] }
  0x36   : > { %v327_v30 = vld [vmem:[%s1212_s28] sm:$0x1f] }
  0x37   : > { %v316_v31 = vld [vmem:[%s1212_s28] sm:$0x1f] }
  0x38   : > { %v173_v32 = vld [vmem:[%s1212_s28] sm:$0x1f] }
  0x39   : > { %483 = vrot.lane.b32.xlu1 %v481_v12, %s1109_s20  ;;  %s1126_s20 = smov 115   ;;  %v195_v33 = vld [vmem:[%s1212_s28] sm:$0x1f] }
  0x3a   : > { %472 = vrot.lane.b32.xlu0 %v470_v13, %s1110_s24  ;;  %s1127_s24 = smov 113   ;;  %v184_v34 = vld [vmem:[%s1212_s28] sm:$0x1f] }
  0x3b   : > { %494 = vrot.lane.b32.xlu2 %v492_v14, %s1111_s25  ;;  %s1128_s25 = smov 114   ;;  %v206_v35 = vld [vmem:[%s1212_s28] sm:$0x1f] }
  0x3c   : > { %v228_v38 = vld [vmem:[%s1212_s28] sm:$0x1f] }
  0x3d   : > { %v217_v39 = vld [vmem:[%s1212_s28] sm:$0x1f] }
  0x3e   : > { %v239_v43 = vld [vmem:[%s1212_s28] sm:$0x1f] }
  0x41   : > { %340 = vrot.lane.b32.xlu1 %v338_v16, %s1113_s27  ;;  %s1130_s27 = smov 125  }
  0x42   : > { %505 = vrot.lane.b32.xlu0 %v503_v15, %s1112_s26  ;;  %s1129_s26 = smov 127  }
  0x43   : > { %351 = vrot.lane.b32.xlu2 %v349_v17, %s1114_s29  ;;  %s1131_s29 = smov 126  }
  0x49   : > { %373 = vrot.lane.b32.xlu1 %v371_v19, %s1116_s4  ;;  %s1133_s4 = smov 122  }
  0x4a   : > { %362 = vrot.lane.b32.xlu0 %v360_v18, %s1115_s30  ;;  %s1132_s30 = smov 124  }
  0x4b   : > { %384 = vrot.lane.b32.xlu2 %v382_v20, %s1117_s5  ;;  %s1134_s5 = smov 123  }
  0x51   : > { %406 = vrot.lane.b32.xlu1 %v404_v22, %s1119_s7  ;;  %s947_s7 = sshll.u32 %s1180_s16, 7 }
  0x52   : > { %395 = vrot.lane.b32.xlu0 %v393_v21, %s1118_s6  ;;  %s1135_s6 = smov 121  }
  0x53   : > { %417 = vrot.lane.b32.xlu2 %v415_v23, %s1120_s8 }
  0x59   : > { %263 = vrot.lane.b32.xlu1 %v261_v24, %s1121_s9 }
  0x5a   : > { %252 = vrot.lane.b32.xlu0 %v250_v25, %s1122_s10  ;;  %s855_s10 = scalar_lea.hbm %s1436_s3, %s947_s7 }
  0x5b   : > { %274 = vrot.lane.b32.xlu2 %v272_v26, %s1123_s11  ;;  %s858_s11 = sshll.u32 %s855_s10, 4  ;;  %s859_s11 = int_to_ptr.hbm [resolvable:$true] %s858_s11 }
  0x61   : > { %296 = vrot.lane.b32.xlu1 %v294_v27, %s1124_s17 }
  0x62   : > { %285 = vrot.lane.b32.xlu0 %v283_v28, %s1125_s19  ;;  %s1047_s19 = sshra.s32 %s859_s11, 4  ;;  %s1048_s19 = int_to_ptr.hbm [resolvable:$true] %s1047_s19 }
  0x63   : > { %307 = vrot.lane.b32.xlu2 %v305_v29, %s1126_s20  ;;  %s1049_s20 = scalar_lea.hbm %s1048_s19, 128  ;;  %p1054_p0 = scmp.lt.s32.totalorder %s1048_s19, %s1436_s3 }
  0x64   : > { %p1050_p11 = scmp.ne.s32.totalorder %s1048_s19, %s1049_s20 }
  0x66   : > { %p1051_p12 = pnand %p1050_p11, %p1197_p5 }
  0x68   : > { %p1052_p13 = pneg %p1051_p12 }
  0x69   : > { %329 = vrot.lane.b32.xlu1 %v327_v30, %s1127_s24 }
  0x6a   : > { %318 = vrot.lane.b32.xlu0 %v316_v31, %s1128_s25 }
  0x6b   : > { %175 = vrot.lane.b32.xlu2 %v173_v32, %s1129_s26  ;;  %s1053_s26 = scalar_lea.hbm %s1436_s3, 256 }
  0x6c   : > { %p1055_p1 = scmp.lt.s32.totalorder %s1053_s26, %s1049_s20 }
  0x6e   : > { %p1056_p2 = por %p1055_p1, %p1054_p0 }
  0x70   : > { %p1057_p3 = pnand %p1056_p2, %p1052_p13 }
  0x71   : > { %197 = vrot.lane.b32.xlu1 %v195_v33, %s1130_s27 }
  0x72   : > { %186 = vrot.lane.b32.xlu0 %v184_v34, %s1131_s29 }
  0x73   : > { %208 = vrot.lane.b32.xlu2 %v206_v35, %s1132_s30 }
  0x75   : > { %v561_v37 = vpop.permute.xlu2 %560 }
  0x76   : > { %v562_v41 = vrot.slane %v561_v37, 1 }
  0x78   : > { %v564_v42 = vsel %vm563_vm0, %v561_v37, %v562_v41  ;;  %vm486_vm0 = vcmask 809984  }
  0x79   : > { %230 = vrot.lane.b32.xlu1 %v228_v38, %s1133_s4  ;;  %567 = vst.msk [vmem:[#allocation2 + $0x84] ss:$8 sm:$0xf] %vm1252_vm1, %v564_v42 }
  0x7a   : > { %219 = vrot.lane.b32.xlu0 %v217_v39, %s1134_s5  ;;  %s159_s5 = sand.u32 1, %s1087_s13  }
  0x7b   : > { %241 = vrot.lane.b32.xlu2 %v239_v43, %s1135_s6  ;;  %s925_s6 = sshll.u32 %s159_s5, 7  ;;  %s844_s17 = scalar_lea.sflag [#allocation4], %s159_s5 }
  0x7d   : > { %v572_v44 = vpop.permute.xlu2 %571 }
  0x7e   : > { %v573_v45 = vrot.slane %v572_v44, 1 }
  0x80   : > { %v575_v46 = vsel %vm574_vm2, %v572_v44, %v573_v45  ;;  %vm475_vm2 = vcmask 818176  }
  0x81   : > { %578 = vst.msk [vmem:[#allocation2 + $0x85] ss:$8 sm:$0xf] %vm1252_vm1, %v575_v46 }
  0x85   : > { %v429_v47 = vpop.permute.xlu2 %428 }
  0x86   : > { %v430_v48 = vrot.slane %v429_v47, 1 }
  0x88   : > { %v432_v49 = vsel %vm431_vm3, %v429_v47, %v430_v48  ;;  %vm420_vm3 = vcmask 859136  }
  0x89   : > { %435 = vst.msk [vmem:[#allocation2 + $0x60] ss:$8 sm:$0xf] %vm1252_vm1, %v432_v49 }
  0x8b   : > { %v539_v50 = vpop.permute.xlu1 %538 }
  0x8c   : > { %v517_v51 = vpop.permute.xlu0 %516  ;;  %v540_v52 = vrot.slane %v539_v50, 1 }
  0x8d   : > { %v518_v53 = vrot.slane %v517_v51, 1  ;;  %v462_v54 = vpop.permute.xlu2 %461 }
  0x8e   : > { %v542_v55 = vsel %vm541_vm4, %v539_v50, %v540_v52  ;;  %v463_v57 = vrot.slane %v462_v54, 1  ;;  %vm508_vm4 = vcmask 793600  }
  0x8f   : > { %v520_v56 = vsel %vm519_vm5, %v517_v51, %v518_v53  ;;  %545 = vst.msk [vmem:[#allocation2 + $0x82] ss:$8 sm:$0xf] %vm1252_vm1, %v542_v55  ;;  %vm343_vm5 = vcmask 916480  }
  0x90   : > { %523 = vst.msk [vmem:[#allocation2 + $0x80] ss:$8 sm:$0xf] %vm1252_vm1, %v520_v56  ;;  %v465_v58 = vsel %vm464_vm6, %v462_v54, %v463_v57  ;;  %vm277_vm6 = vcmask 965632  }
  0x91   : > { %468 = vst.msk [vmem:[#allocation2 + $0x63] ss:$8 sm:$0xf] %vm1252_vm1, %v465_v58 }
  0x93   : > { %v550_v59 = vpop.permute.xlu1 %549 }
  0x94   : > { %v528_v60 = vpop.permute.xlu0 %527  ;;  %v551_v61 = vrot.slane %v550_v59, 1 }
  0x95   : > { %v529_v62 = vrot.slane %v528_v60, 1  ;;  %v495_v63 = vpop.permute.xlu2 %494 }
  0x96   : > { %v553_v0 = vsel %vm552_vm7, %v550_v59, %v551_v61  ;;  %v496_v2 = vrot.slane %v495_v63, 1  ;;  %vm365_vm7 = vcmask 900096  }
  0x97   : > { %v531_v1 = vsel %vm530_vm8, %v528_v60, %v529_v62  ;;  %556 = vst.msk [vmem:[#allocation2 + $0x83] ss:$8 sm:$0xf] %vm1252_vm1, %v553_v0  ;;  %vm376_vm8 = vcmask 891904  }
  0x98   : > { %534 = vst.msk [vmem:[#allocation2 + $0x81] ss:$8 sm:$0xf] %vm1252_vm1, %v531_v1  ;;  %v498_v3 = vsel %vm497_vm9, %v495_v63, %v496_v2  ;;  %vm310_vm9 = vcmask 941056  }
  0x99   : > { %501 = vst.msk [vmem:[#allocation2 + $0x66] ss:$8 sm:$0xf] %vm1252_vm1, %v498_v3 }
  0x9b   : > { %v594_v4 = vpop.permute.xlu1 %593 }
  0x9c   : > { %v583_v5 = vpop.permute.xlu0 %582  ;;  %v595_v6 = vrot.slane %v594_v4, 1 }
  0x9d   : > { %v584_v7 = vrot.slane %v583_v5, 1  ;;  %v352_v8 = vpop.permute.xlu2 %351 }
  0x9e   : > { %v597_v9 = vsel %vm596_vm10, %v594_v4, %v595_v6  ;;  %v353_v11 = vrot.slane %v352_v8, 1  ;;  %vm398_vm10 = vcmask 875520  }
  0x9f   : > { %v586_v10 = vsel %vm585_vm11, %v583_v5, %v584_v7  ;;  %600 = vst.msk [vmem:[#allocation2 + $0x87] ss:$8 sm:$0xf] %vm1252_vm1, %v597_v9  ;;  %vm409_vm11 = vcmask 867328  }
  0xa0   : > { %589 = vst.msk [vmem:[#allocation2 + $0x86] ss:$8 sm:$0xf] %vm1252_vm1, %v586_v10  ;;  %v355_v12 = vsel %vm354_vm12, %v352_v8, %v353_v11  ;;  %vm178_vm12 = vcmask 1039360  }
  0xa1   : > { %358 = vst.msk [vmem:[#allocation2 + $0x41] ss:$8 sm:$0xf] %vm1252_vm1, %v355_v12 }
  0xa3   : > { %v451_v13 = vpop.permute.xlu1 %450 }
  0xa4   : > { %v440_v14 = vpop.permute.xlu0 %439  ;;  %v452_v15 = vrot.slane %v451_v13, 1 }
  0xa5   : > { %v441_v16 = vrot.slane %v440_v14, 1  ;;  %v385_v17 = vpop.permute.xlu2 %384 }
  0xa6   : > { %v454_v18 = vsel %vm453_vm13, %v451_v13, %v452_v15  ;;  %v386_v20 = vrot.slane %v385_v17, 1  ;;  %vm266_vm13 = vcmask 973824  }
  0xa7   : > { %v443_v19 = vsel %vm442_vm14, %v440_v14, %v441_v16  ;;  %457 = vst.msk [vmem:[#allocation2 + $0x62] ss:$8 sm:$0xf] %vm1252_vm1, %v454_v18  ;;  %v622_v21 = vld [vmem:[#allocation2 + $0x80] sm:$0xff]  ;;  %v623_v22 = vld [vmem:[#allocation2 + $0x88] sm:$0xff]  ;;  %v624_v23 = vld [vmem:[#allocation2 + $0x90] sm:$0xff] }
  0xa8   : > { %446 = vst.msk [vmem:[#allocation2 + $0x61] ss:$8 sm:$0xf] %vm1252_vm1, %v443_v19  ;;  %650 = vmatpush.msra.mxu0 %v622_v21  ;;  %679 = vmatpush.msra.mxu1 %v623_v22  ;;  %v625_v24 = vld [vmem:[#allocation2 + $0x98] sm:$0xff]  ;;  %v388_v25 = vsel %vm387_vm15, %v385_v17, %v386_v20  ;;  %vm255_vm14 = vcmask 982016   ;;  %vm211_vm15 = vcmask 1014784  }
  0xa9   : > { %708 = vmatpush.msra.mxu2 %v624_v23  ;;  %737 = vmatpush.msra.mxu3 %v625_v24  ;;  %391 = vst.msk [vmem:[#allocation2 + $0x44] ss:$8 sm:$0xf] %vm1252_vm1, %v388_v25  ;;  %v166_v16 = vld [vmem:[%s1212_s28] sm:$0xf]  ;;  %s1381_s28 = scalar_lea.vmem [#allocation3], %s925_s6 }
  0xaa   : > { %171 = vst.msk [vmem:[#allocation2] ss:$8 sm:$0xf] %vm1252_vm1, %v166_v16  ;;  %s856_s16 = sshll.u32 %s1381_s28, 4  ;;  %s857_s16 = int_to_ptr.vmem [resolvable:$true] %s856_s16 }
  0xab   : > { %v484_v26 = vpop.permute.xlu1 %483 }
  0xac   : > { %v473_v27 = vpop.permute.xlu0 %472  ;;  %v485_v28 = vrot.slane %v484_v26, 1 }
  0xad   : > { %v474_v29 = vrot.slane %v473_v27, 1  ;;  %v418_v30 = vpop.permute.xlu2 %417 }
  0xae   : > { %v487_v31 = vsel %vm486_vm0, %v484_v26, %v485_v28  ;;  %v419_v33 = vrot.slane %v418_v30, 1  ;;  %vm299_vm0 = vcmask 949248  }
  0xaf   : > { %v476_v32 = vsel %vm475_vm2, %v473_v27, %v474_v29  ;;  %490 = vst.msk [vmem:[#allocation2 + $0x65] ss:$8 sm:$0xf] %vm1252_vm1, %v487_v31  ;;  %vm288_vm2 = vcmask 957440  }
  0xb0   : > { %479 = vst.msk [vmem:[#allocation2 + $0x64] ss:$8 sm:$0xf] %vm1252_vm1, %v476_v32  ;;  %v421_v34 = vsel %vm420_vm3, %v418_v30, %v419_v33  ;;  %vm244_vm3 = vcmask 990208  }
  0xb1   : > { %424 = vst.msk [vmem:[#allocation2 + $0x47] ss:$8 sm:$0xf] %vm1252_vm1, %v421_v34  ;;  %v755_v34 = vld [vmem:[%s1435_s2] sm:$0xff] }
  0xb3   : > { %v341_v36 = vpop.permute.xlu1 %340 }
  0xb4   : > { %v506_v35 = vpop.permute.xlu0 %505  ;;  %v342_v38 = vrot.slane %v341_v36, 1 }
  0xb5   : > { %v507_v37 = vrot.slane %v506_v35, 1  ;;  %v275_v39 = vpop.permute.xlu2 %274 }
  0xb6   : > { %v344_v42 = vsel %vm343_vm5, %v341_v36, %v342_v38  ;;  %v276_v43 = vrot.slane %v275_v39, 1  ;;  %vm321_vm5 = vcmask 932864  }
  0xb7   : > { %v509_v41 = vsel %vm508_vm4, %v506_v35, %v507_v37  ;;  %347 = vst.msk [vmem:[#allocation2 + $0x40] ss:$8 sm:$0xf] %vm1252_vm1, %v344_v42  ;;  %vm332_vm4 = vcmask 924672   ;;  %v1136_v37 = vmov 0  }
  0xb8   : > { %512 = vst.msk [vmem:[#allocation2 + $0x67] ss:$8 sm:$0xf] %vm1252_vm1, %v509_v41  ;;  %v278_v44 = vsel %vm277_vm6, %v275_v39, %v276_v43  ;;  %vm200_vm6 = vcmask 1022976   ;;  %1030 = vset.pattern.permute.xlu0 %v1136_v37  ;;  %1031 = vset.pattern.permute.xlu1 %v1136_v37 }
  0xb9   : > { %281 = vst.msk [vmem:[#allocation2 + $0x22] ss:$8 sm:$0xf] %vm1252_vm1, %v278_v44  ;;  %777 = vperm.xlu0 %1030, %v755_v34   ;;  %1032 = vset.pattern.permute.xlu2 %v1136_v37 }
  0xbb   : > { %v374_v46 = vpop.permute.xlu1 %373 }
  0xbc   : > { %v363_v45 = vpop.permute.xlu0 %362  ;;  %v375_v48 = vrot.slane %v374_v46, 1 }
  0xbd   : > { %v364_v47 = vrot.slane %v363_v45, 1  ;;  %v308_v49 = vpop.permute.xlu2 %307 }
  0xbe   : > { %v377_v51 = vsel %vm376_vm8, %v374_v46, %v375_v48  ;;  %v309_v55 = vrot.slane %v308_v49, 1  ;;  %vm233_vm8 = vcmask 998400  }
  0xbf   : > { %v366_v50 = vsel %vm365_vm7, %v363_v45, %v364_v47  ;;  %v618_v52 = vld [vmem:[#allocation2 + $0x60] sm:$0xff]  ;;  %v619_v53 = vld [vmem:[#allocation2 + $0x68] sm:$0xff]  ;;  %v620_v54 = vld [vmem:[#allocation2 + $0x70] sm:$0xff]  ;;  %380 = vst.msk [vmem:[#allocation2 + $0x43] ss:$8 sm:$0xf] %vm1252_vm1, %v377_v51 }
  0xc0   : > { %369 = vst.msk [vmem:[#allocation2 + $0x42] ss:$8 sm:$0xf] %vm1252_vm1, %v366_v50  ;;  %651 = vmatpush.msra.mxu0 %v618_v52  ;;  %680 = vmatpush.msra.mxu1 %v619_v53  ;;  %v621_v56 = vld [vmem:[#allocation2 + $0x78] sm:$0xff]  ;;  %v311_v57 = vsel %vm310_vm9, %v308_v49, %v309_v55  ;;  %vm189_vm7 = vcmask 1031168   ;;  %vm222_vm9 = vcmask 1006592  }
  0xc1   : > { %709 = vmatpush.msra.mxu2 %v620_v54  ;;  %738 = vmatpush.msra.mxu3 %v621_v56  ;;  %314 = vst.msk [vmem:[#allocation2 + $0x25] ss:$8 sm:$0xf] %vm1252_vm1, %v311_v57  ;;  %v756_v47 = vld [vmem:[%s1435_s2 + $0x8] sm:$0xff]  ;;  %v758_v52 = vld [vmem:[%s1435_s2 + $0x18] sm:$0xff]  ;;  %v757_v53 = vld [vmem:[%s1435_s2 + $0x10] sm:$0xff] }
  0xc2   : > { %782 = vperm.xlu1 %1031, %v756_v47   ;;  %787 = vperm.xlu2 %1032, %v757_v53   ;;  %v602_v54 = vld [vmem:[%s1434_s1] sm:$0xff] }
  0xc3   : > { %v407_v59 = vpop.permute.xlu1 %406 }
  0xc4   : > { %v396_v58 = vpop.permute.xlu0 %395  ;;  %v408_v61 = vrot.slane %v407_v59, 1 }
  0xc5   : > { %v397_v60 = vrot.slane %v396_v58, 1  ;;  %v176_v62 = vpop.permute.xlu2 %175 }
  0xc6   : > { %v410_v0 = vsel %vm409_vm11, %v407_v59, %v408_v61  ;;  %v177_v1 = vrot.slane %v176_v62, 1  ;;  %v604_v59 = vld [vmem:[%s1434_s1 + $0x10] sm:$0xff] }
  0xc7   : > { %v399_v63 = vsel %vm398_vm10, %v396_v58, %v397_v60  ;;  %413 = vst.msk [vmem:[#allocation2 + $0x46] ss:$8 sm:$0xf] %vm1252_vm1, %v410_v0  ;;  %vm626_vm10 = vcmask 326656   ;;  %v603_v58 = vld [vmem:[%s1434_s1 + $0x8] sm:$0xff]  ;;  %v605_v60 = vld [vmem:[%s1434_s1 + $0x18] sm:$0xff] }
  0xc8   : > { %402 = vst.msk [vmem:[#allocation2 + $0x45] ss:$8 sm:$0xf] %vm1252_vm1, %v399_v63  ;;  %v179_v2 = vsel %vm178_vm12, %v176_v62, %v177_v1 }
  0xc9   : > { %182 = vst.msk [vmem:[#allocation2 + $0x1] ss:$8 sm:$0xf] %vm1252_vm1, %v179_v2 }
  0xca   : > { %792 = vperm.xlu1 %1031, %v758_v52  }
  0xcb   : > { %v264_v3 = vpop.permute.xlu1 %263 }
  0xcc   : > { %v253_v4 = vpop.permute.xlu0 %252  ;;  %v265_v5 = vrot.slane %v264_v3, 1 }
  0xcd   : > { %v254_v6 = vrot.slane %v253_v4, 1  ;;  %v209_v7 = vpop.permute.xlu2 %208 }
  0xce   : > { %v267_v8 = vsel %vm266_vm13, %v264_v3, %v265_v5  ;;  %v210_v10 = vrot.slane %v209_v7, 1 }
  0xcf   : > { %v256_v9 = vsel %vm255_vm14, %v253_v4, %v254_v6  ;;  %270 = vst.msk [vmem:[#allocation2 + $0x21] ss:$8 sm:$0xf] %vm1252_vm1, %v267_v8  ;;  %v614_v11 = vld [vmem:[#allocation2 + $0x40] sm:$0xff]  ;;  %v615_v12 = vld [vmem:[#allocation2 + $0x48] sm:$0xff]  ;;  %v616_v13 = vld [vmem:[#allocation2 + $0x50] sm:$0xff] }
  0xd0   : > { %259 = vst.msk [vmem:[#allocation2 + $0x20] ss:$8 sm:$0xf] %vm1252_vm1, %v256_v9  ;;  %652 = vmatpush.msra.mxu0 %v614_v11  ;;  %681 = vmatpush.msra.mxu1 %v615_v12  ;;  %v617_v14 = vld [vmem:[#allocation2 + $0x58] sm:$0xff]  ;;  %v212_v15 = vsel %vm211_vm15, %v209_v7, %v210_v10 }
  0xd1   : > { %710 = vmatpush.msra.mxu2 %v616_v13  ;;  %739 = vmatpush.msra.mxu3 %v617_v14  ;;  %215 = vst.msk [vmem:[#allocation2 + $0x4] ss:$8 sm:$0xf] %vm1252_vm1, %v212_v15 }
  0xd3   : > { %v297_v17 = vpop.permute.xlu1 %296 }
  0xd4   : > { %v286_v18 = vpop.permute.xlu0 %285  ;;  %v298_v19 = vrot.slane %v297_v17, 1 }
  0xd5   : > { %v287_v20 = vrot.slane %v286_v18, 1  ;;  %v242_v21 = vpop.permute.xlu2 %241 }
  0xd6   : > { %v300_v22 = vsel %vm299_vm0, %v297_v17, %v298_v19  ;;  %v243_v24 = vrot.slane %v242_v21, 1 }
  0xd7   : > { %v289_v23 = vsel %vm288_vm2, %v286_v18, %v287_v20  ;;  %303 = vst.msk [vmem:[#allocation2 + $0x24] ss:$8 sm:$0xf] %vm1252_vm1, %v300_v22 }
  0xd8   : > { %292 = vst.msk [vmem:[#allocation2 + $0x23] ss:$8 sm:$0xf] %vm1252_vm1, %v289_v23  ;;  %v245_v25 = vsel %vm244_vm3, %v242_v21, %v243_v24 }
  0xd9   : > { %248 = vst.msk [vmem:[#allocation2 + $0x7] ss:$8 sm:$0xf] %vm1252_vm1, %v245_v25 }
  0xdb   : > { %v330_v26 = vpop.permute.xlu1 %329 }
  0xdc   : > { %v319_v27 = vpop.permute.xlu0 %318  ;;  %v331_v28 = vrot.slane %v330_v26, 1 }
  0xdd   : > { %v320_v29 = vrot.slane %v319_v27, 1 }
  0xde   : > { %v333_v30 = vsel %vm332_vm4, %v330_v26, %v331_v28 }
  0xdf   : > { %v322_v31 = vsel %vm321_vm5, %v319_v27, %v320_v29  ;;  %336 = vst.msk [vmem:[#allocation2 + $0x27] ss:$8 sm:$0xf] %vm1252_vm1, %v333_v30 }
  0xe0   : > { %325 = vst.msk [vmem:[#allocation2 + $0x26] ss:$8 sm:$0xf] %vm1252_vm1, %v322_v31 }
  0xe3   : > { %v198_v32 = vpop.permute.xlu1 %197 }
  0xe4   : > { %v187_v33 = vpop.permute.xlu0 %186  ;;  %v199_v35 = vrot.slane %v198_v32, 1 }
  0xe5   : > { %v188_v36 = vrot.slane %v187_v33, 1 }
  0xe6   : > { %v201_v38 = vsel %vm200_vm6, %v198_v32, %v199_v35 }
  0xe7   : > { %v190_v39 = vsel %vm189_vm7, %v187_v33, %v188_v36  ;;  %204 = vst.msk [vmem:[#allocation2 + $0x3] ss:$8 sm:$0xf] %vm1252_vm1, %v201_v38  ;;  %v610_v41 = vld [vmem:[#allocation2 + $0x20] sm:$0xff]  ;;  %v611_v42 = vld [vmem:[#allocation2 + $0x28] sm:$0xff]  ;;  %v612_v43 = vld [vmem:[#allocation2 + $0x30] sm:$0xff] }
  0xe8   : > { %193 = vst.msk [vmem:[#allocation2 + $0x2] ss:$8 sm:$0xf] %vm1252_vm1, %v190_v39  ;;  %653 = vmatpush.msra.mxu0 %v610_v41  ;;  %682 = vmatpush.msra.mxu1 %v611_v42  ;;  %v613_v44 = vld [vmem:[#allocation2 + $0x38] sm:$0xff] }
  0xe9   : > { %711 = vmatpush.msra.mxu2 %v612_v43  ;;  %740 = vmatpush.msra.mxu3 %v613_v44 }
  0xeb   : > { %v231_v45 = vpop.permute.xlu1 %230 }
  0xec   : > { %v220_v46 = vpop.permute.xlu0 %219  ;;  %v232_v48 = vrot.slane %v231_v45, 1 }
  0xed   : > { %v221_v49 = vrot.slane %v220_v46, 1 }
  0xee   : > { %v234_v50 = vsel %vm233_vm8, %v231_v45, %v232_v48 }
  0xef   : > { %v223_v51 = vsel %vm222_vm9, %v220_v46, %v221_v49  ;;  %237 = vst.msk [vmem:[#allocation2 + $0x6] ss:$8 sm:$0xf] %vm1252_vm1, %v234_v50 }
  0xf0   : > { %226 = vst.msk [vmem:[#allocation2 + $0x5] ss:$8 sm:$0xf] %vm1252_vm1, %v223_v51 }
  0xf7   : > { %v606_v55 = vld [vmem:[#allocation2] sm:$0xff]  ;;  %v607_v56 = vld [vmem:[#allocation2 + $0x8] sm:$0xff]  ;;  %v608_v57 = vld [vmem:[#allocation2 + $0x10] sm:$0xff] }
  0xf8   : > { %654 = vmatpush.msra.mxu0 %v606_v55  ;;  %683 = vmatpush.msra.mxu1 %v607_v56  ;;  %v609_v40 = vld [vmem:[#allocation2 + $0x18] sm:$0xff] }
  0xf9   : > { %712 = vmatpush.msra.mxu2 %v608_v57  ;;  %741 = vmatpush.msra.mxu3 %v609_v40 }
  0xfa   : > { %926 = vmatmul.msk.f32.vlgmr.msra.gmra.mxu0 %vm626_vm10, %v602_v54  ;;  %930 = vmatmul.msk.f32.vlgmr.msra.gmra.mxu1 %vm626_vm10, %v602_v54 }
  0xfb   : > { %934 = vmatmul.msk.f32.vlgmr.msra.gmra.mxu2 %vm626_vm10, %v602_v54  ;;  %938 = vmatmul.msk.f32.vlgmr.msra.gmra.mxu3 %vm626_vm10, %v602_v54 }
 0x102   : > { %927 = vmatmul.msk.f32.gmra.mxu0 %vm626_vm10, %v603_v58  ;;  %931 = vmatmul.msk.f32.gmra.mxu1 %vm626_vm10, %v603_v58 }
 0x103   : > { %935 = vmatmul.msk.f32.gmra.mxu2 %vm626_vm10, %v603_v58  ;;  %939 = vmatmul.msk.f32.gmra.mxu3 %vm626_vm10, %v603_v58 }
 0x10a   : > { %928 = vmatmul.msk.f32.gmra.mxu0 %vm626_vm10, %v604_v59  ;;  %932 = vmatmul.msk.f32.gmra.mxu1 %vm626_vm10, %v604_v59 }
 0x10b   : > { %936 = vmatmul.msk.f32.gmra.mxu2 %vm626_vm10, %v604_v59  ;;  %940 = vmatmul.msk.f32.gmra.mxu3 %vm626_vm10, %v604_v59 }
 0x112   : > { %929 = vmatmul.msk.f32.gmra.mxu0 %vm626_vm10, %v605_v60  ;;  %933 = vmatmul.msk.f32.gmra.mxu1 %vm626_vm10, %v605_v60 }
 0x113   : > { %937 = vmatmul.msk.f32.gmra.mxu2 %vm626_vm10, %v605_v60  ;;  %941 = vmatmul.msk.f32.gmra.mxu3 %vm626_vm10, %v605_v60 }
 0x11c   : > { %v788_v17 = vpop.permute.xlu2 %787 }
 0x12b   : > { %v778_v61 = vpop.permute.xlu0 %777 }
 0x134   : > { %v783_v4 = vpop.permute.xlu1 %782 }
 0x13c   : > { %v793_v30 = vpop.permute.xlu1 %792 }
 0x177   : > { %v656_v62 = vpop.f32.mrf.mxu0  ;;  %v685_v63 = vpop.f32.mrf.mxu1 }
 0x178   : > { %vm759_vm1 = vcmp.ge.f32.partialorder %v656_v62, 0.0  ;;  %vm760_vm11 = vcmp.ge.f32.partialorder %v685_v63, 0.0  ;;  %v795_v0 = vmul.f32 %v778_v61, %v656_v62  ;;  %v796_v1 = vmul.f32 %v778_v61, %v685_v63 }
 0x17a   : > { %v811_v2 = vsel %vm759_vm1, %v656_v62, %v795_v0  ;;  %v812_v3 = vsel %vm760_vm11, %v685_v63, %v796_v1 }
 0x17b   : > { %827 = vst [vmem:[%s1381_s28] sm:$0xff] %v811_v2 }
 0x17c   : > { %828 = vst [vmem:[%s1381_s28 + $0x8] sm:$0xff] %v812_v3 }
 0x17e   : > { %v714_v5 = vpop.f32.mrf.mxu2  ;;  %v743_v6 = vpop.f32.mrf.mxu3 }
 0x17f   : > { %vm761_vm12 = vcmp.ge.f32.partialorder %v714_v5, 0.0  ;;  %v797_v7 = vmul.f32 %v778_v61, %v714_v5  ;;  %vm762_vm13 = vcmp.ge.f32.partialorder %v743_v6, 0.0  ;;  %v798_v8 = vmul.f32 %v778_v61, %v743_v6  ;;  %v659_v9 = vpop.f32.mrf.mxu0  ;;  %v688_v10 = vpop.f32.mrf.mxu1 }
 0x180   : > { %vm763_vm14 = vcmp.ge.f32.partialorder %v659_v9, 0.0  ;;  %vm764_vm15 = vcmp.ge.f32.partialorder %v688_v10, 0.0  ;;  %v799_v11 = vmul.f32 %v783_v4, %v659_v9  ;;  %v800_v12 = vmul.f32 %v783_v4, %v688_v10 }
 0x181   : > { %v813_v13 = vsel %vm761_vm12, %v714_v5, %v797_v7  ;;  %v814_v14 = vsel %vm762_vm13, %v743_v6, %v798_v8 }
 0x182   : > { %829 = vst [vmem:[%s1381_s28 + $0x10] sm:$0xff] %v813_v13  ;;  %v815_v15 = vsel %vm763_vm14, %v659_v9, %v799_v11  ;;  %v816_v16 = vsel %vm764_vm15, %v688_v10, %v800_v12 }
 0x183   : > { %830 = vst [vmem:[%s1381_s28 + $0x18] sm:$0xff] %v814_v14 }
 0x184   : > { %831 = vst [vmem:[%s1381_s28 + $0x20] sm:$0xff] %v815_v15 }
 0x185   : > { %832 = vst [vmem:[%s1381_s28 + $0x28] sm:$0xff] %v816_v16 }
 0x186   : > { %v717_v18 = vpop.f32.mrf.mxu2  ;;  %v746_v19 = vpop.f32.mrf.mxu3 }
 0x187   : > { %vm765_vm0 = vcmp.ge.f32.partialorder %v717_v18, 0.0  ;;  %v801_v20 = vmul.f32 %v783_v4, %v717_v18  ;;  %vm766_vm2 = vcmp.ge.f32.partialorder %v746_v19, 0.0  ;;  %v802_v21 = vmul.f32 %v783_v4, %v746_v19  ;;  %v662_v22 = vpop.f32.mrf.mxu0  ;;  %v691_v23 = vpop.f32.mrf.mxu1 }
 0x188   : > { %vm767_vm3 = vcmp.ge.f32.partialorder %v662_v22, 0.0  ;;  %vm768_vm4 = vcmp.ge.f32.partialorder %v691_v23, 0.0  ;;  %v803_v24 = vmul.f32 %v788_v17, %v662_v22  ;;  %v804_v25 = vmul.f32 %v788_v17, %v691_v23 }
 0x189   : > { %v817_v26 = vsel %vm765_vm0, %v717_v18, %v801_v20  ;;  %v818_v27 = vsel %vm766_vm2, %v746_v19, %v802_v21 }
 0x18a   : > { %833 = vst [vmem:[%s1381_s28 + $0x30] sm:$0xff] %v817_v26  ;;  %v819_v28 = vsel %vm767_vm3, %v662_v22, %v803_v24  ;;  %v820_v29 = vsel %vm768_vm4, %v691_v23, %v804_v25 }
 0x18b   : > { %834 = vst [vmem:[%s1381_s28 + $0x38] sm:$0xff] %v818_v27 }
 0x18c   : > { %835 = vst [vmem:[%s1381_s28 + $0x40] sm:$0xff] %v819_v28 }
 0x18d   : > { %836 = vst [vmem:[%s1381_s28 + $0x48] sm:$0xff] %v820_v29 }
 0x18e   : > { %v720_v31 = vpop.f32.mrf.mxu2  ;;  %v749_v32 = vpop.f32.mrf.mxu3 }
 0x18f   : > { %vm769_vm5 = vcmp.ge.f32.partialorder %v720_v31, 0.0  ;;  %v805_v33 = vmul.f32 %v788_v17, %v720_v31  ;;  %vm770_vm6 = vcmp.ge.f32.partialorder %v749_v32, 0.0  ;;  %v806_v34 = vmul.f32 %v788_v17, %v749_v32  ;;  %v665_v35 = vpop.f32.mrf.mxu0  ;;  %v694_v36 = vpop.f32.mrf.mxu1 }
 0x190   : > { %vm771_vm7 = vcmp.ge.f32.partialorder %v665_v35, 0.0  ;;  %v807_v37 = vmul.f32 %v793_v30, %v665_v35  ;;  %vm772_vm8 = vcmp.ge.f32.partialorder %v694_v36, 0.0  ;;  %v808_v38 = vmul.f32 %v793_v30, %v694_v36 }
 0x191   : > { %v821_v39 = vsel %vm769_vm5, %v720_v31, %v805_v33  ;;  %v822_v41 = vsel %vm770_vm6, %v749_v32, %v806_v34 }
 0x192   : > { %837 = vst [vmem:[%s1381_s28 + $0x50] sm:$0xff] %v821_v39  ;;  %v823_v42 = vsel %vm771_vm7, %v665_v35, %v807_v37  ;;  %v824_v43 = vsel %vm772_vm8, %v694_v36, %v808_v38 }
 0x193   : > { %838 = vst [vmem:[%s1381_s28 + $0x58] sm:$0xff] %v822_v41 }
 0x194   : > { %839 = vst [vmem:[%s1381_s28 + $0x60] sm:$0xff] %v823_v42 }
 0x195   : > { %840 = vst [vmem:[%s1381_s28 + $0x68] sm:$0xff] %v824_v43 }
 0x196   : > { %v723_v44 = vpop.f32.mrf.mxu2  ;;  %v752_v45 = vpop.f32.mrf.mxu3 }
 0x197   : > { %vm773_vm9 = vcmp.ge.f32.partialorder %v723_v44, 0.0  ;;  %v809_v46 = vmul.f32 %v793_v30, %v723_v44  ;;  %vm774_vm10 = vcmp.ge.f32.partialorder %v752_v45, 0.0  ;;  %v810_v47 = vmul.f32 %v793_v30, %v752_v45 }
 0x199   : > { %v825_v48 = vsel %vm773_vm9, %v723_v44, %v809_v46  ;;  %v826_v49 = vsel %vm774_vm10, %v752_v45, %v810_v47 }
 0x19a   : > { %841 = vst [vmem:[%s1381_s28 + $0x70] sm:$0xff] %v825_v48 }
 0x19b   : > { %842 = vst [vmem:[%s1381_s28 + $0x78] sm:$0xff] %v826_v49 }
 0x19c   : > { %1060 = shalt.err (!%p1057_p3)
}
 0x19d   : > { %s1137_s30 = smov 512   ;;  %s1138_s4 = smov 32  }
 0x19e   : > { %949 = dma.vmem_to_hbm [thread:$0]  (%p1197_p5), %s857_s16, 2048, %s859_s11, %s844_s17, %s1137_s30, %s1137_s30, %s1138_s4  }
 0x19f PF: > { %p955_p4 = scmp.ge.s32.totalorder %s1095_s15, 2  ;;  %s873_s5 = sand.u32 1, %s1083_s12  }
 0x1a0   : > { %s874_s6 = scalar_lea.sflag [#allocation4], %s873_s5 }
 0x1a1   : > { %p952_p7 = pnand %p955_p4, %p1201_p6 }
 0x1a3   : > { %p953_p8 = pneg %p952_p7 }
 0x1a5   : > { %1078 = dma.done.wait (%p953_p8), %s874_s6, 2048  }
 0x1a6   : > { %1080 = vsyncadd (%p953_p8), %s874_s6, 4294965248  ;;  %p13_p9 = scmp.ge.s32.totalorder %s1184_s18, 4   ;;  %s1441_s12 = smov %s1087_s13 }
 0x1a7   : > { %s1442_s13 = smov %s1091_s14  ;;  %s1443_s14 = smov %s1195_s21 }
 0x1a8   : > { %s1444_s15 = smov %s1184_s18  ;;  %15 = sbr.rel (!%p13_p9) target bundleno = 3 (0x3), region = 106 }
 0x1ad   :  { %880 = vsyncpa [#allocation4], 1 }
 0x1ae   :  { %882 = vsyncpa [#allocation4 + $0x1], 1 }

</bundles_post_ra>
